<compile_context>
chip_gen: v7x
topology: tpu7x:2x2x1
jax: 0.10.0
libtpu: 0.0.40
codegen_flags: <defaults>
</compile_context>

<pallas_src>
import jax
import jax.numpy as jnp
from jax.experimental import pallas as pl
from jax.experimental.pallas import tpu as pltpu


def _affine_channel_kernel(x_ref, wb_ref, o_ref):
    # x_ref / o_ref: (TR, THW) lane-dense tile (folded N*C rows on sublanes,
    # padded H*W on lanes).  wb_ref: (TR, 2) f32, col 0 = weight, col 1 = bias.
    # The (TR, 1) operands broadcast along lanes directly in the VPU.
    w = wb_ref[:, 0:1]
    b = wb_ref[:, 1:2]
    x = x_ref[...].astype(jnp.float32)
    o_ref[...] = (x * w + b).astype(o_ref.dtype)


def _sublane_multiple(itemsize):
    # Packed-sublane multiple: 8 for 4-byte, 16 for 2-byte, 32 for 1-byte dtypes.
    return max(8, 32 // max(1, itemsize))


def _tile_budget_and_vmem_limit():
    """Generation-aware (target_tile_bytes, vmem_limit_bytes-or-None)."""
    vmem_bytes = None
    try:
        info = pltpu.get_tpu_info()
        vmem_bytes = getattr(info, "vmem_capacity_bytes", None)
    except Exception:
        vmem_bytes = None
    if vmem_bytes is not None and vmem_bytes <= (64 << 20):
        # v7x-class: 64 MiB physical VMEM, ~3.2 TB/s HBM.  Big tiles amortize
        # the ~0.35 us/step overhead; 2 streams x 2 buffers x 10 MiB ~= 40 MiB
        # stays under an explicit 48 MiB scoped limit.
        return 10 << 20, 48 << 20
    if vmem_bytes is not None:
        # v5e / v6e class: 128 MiB physical.  4 MiB tiles -> ~16 MiB pipelined;
        # raise the scoped limit to 32 MiB (v5e's default is only 16 MiB).
        return 4 << 20, 32 << 20
    # Unknown backend (e.g. interpret mode): conservative tile that fits every
    # generation's scoped-VMEM default without overriding it.
    return 2 << 20, None


def _pick_tiles(rows, hw_pad, itemsize, target_bytes):
    """Pick (tile_r, tile_hw) obeying TPU block rules, ~target_bytes per tile.

    hw_pad is already a multiple of 128 (wrapper pads).  Every branch respects
    the byte budget: when rows can't be tiled on a sublane multiple we use the
    full row extent and shrink the lane tile instead.
    """
    sub = _sublane_multiple(itemsize)
    # Lane (last) dim: multiple of 128.  Size it assuming a minimal row tile.
    max_hw = max(128, (target_bytes // (sub * itemsize)) // 128 * 128)
    tile_hw = min(hw_pad, max_hw)
    if rows % sub == 0:
        # Sublane dim: multiple of the packed-sublane count, capped by budget.
        max_r = max(sub, (target_bytes // (tile_hw * itemsize)) // sub * sub)
        tile_r = min(rows, max_r)
    else:
        # Full-extent rows is the only legal non-multiple block; keep the
        # footprint under budget by capping the lane tile instead.
        tile_r = rows
        max_hw = max(128, (target_bytes // (rows * itemsize)) // 128 * 128)
        tile_hw = min(hw_pad, max_hw)
    return tile_r, tile_hw


def affine_channel_2d(x, weight, bias):
    """Channel-wise affine transform, NCHW input.

    x:      (N, C, H, W)
    weight: (C,)
    bias:   (C,)
    returns (N, C, H, W) with y = x * weight[c] + bias[c]
    """
    N, C, H, W = x.shape
    HW = H * W
    rows = N * C
    itemsize = jnp.dtype(x.dtype).itemsize

    target_bytes, vmem_limit = _tile_budget_and_vmem_limit()

    # Fold N into the channel axis and make the lane dim 128-dense.
    x2 = x.reshape(rows, HW)
    hw_pad = ((HW + 127) // 128) * 128
    if hw_pad != HW:
        x2 = jnp.pad(x2, ((0, 0), (0, hw_pad - HW)))

    # Fused compact parameter slab in f32: (N*C, 2), col 0 = weight, col 1 = bias.
    wb_c = jnp.stack(
        [weight.astype(jnp.float32), bias.astype(jnp.float32)], axis=-1)
    wb = jnp.tile(wb_c, (N, 1))

    tile_r, tile_hw = _pick_tiles(rows, hw_pad, itemsize, target_bytes)
    grid = (pl.cdiv(rows, tile_r), pl.cdiv(hw_pad, tile_hw))

    cost = pl.CostEstimate(
        flops=2 * rows * hw_pad,
        transcendentals=0,
        bytes_accessed=2 * rows * hw_pad * itemsize + rows * 2 * 4,
    )

    out2 = pl.pallas_call(
        _affine_channel_kernel,
        out_shape=jax.ShapeDtypeStruct((rows, hw_pad), x.dtype),
        grid_spec=pltpu.PrefetchScalarGridSpec(
            num_scalar_prefetch=0,
            grid=grid,
            in_specs=[
                pl.BlockSpec((tile_r, tile_hw), lambda ri, wi: (ri, wi)),
                # Per-row params: only the row-tile slice is DMA'd.
                pl.BlockSpec((tile_r, 2), lambda ri, wi: (ri, 0)),
            ],
            out_specs=pl.BlockSpec((tile_r, tile_hw), lambda ri, wi: (ri, wi)),
        ),
        compiler_params=pltpu.CompilerParams(
            dimension_semantics=("parallel", "parallel"),
            vmem_limit_bytes=vmem_limit,
        ),
        cost_estimate=cost,
    )(x2, wb)

    if hw_pad != HW:
        out2 = out2[:, :HW]
    return out2.reshape(N, C, H, W)


if __name__ == "__main__":
    key = jax.random.PRNGKey(0)
    kx, kw = jax.random.split(key)

    N, C, H, W = 2, 4, 16, 16
    x = jax.random.normal(kx, (N, C, H, W), dtype=jnp.float32)

    # Parameters per the module __init__: weight ~ uniform_(), bias zero_().
    weight = jax.random.uniform(kw, (C,), dtype=jnp.float32)
    bias = jnp.zeros((C,), dtype=jnp.float32)

    out = affine_channel_2d(x, weight, bias)
    out = jax.block_until_ready(out)

    # Reference check (plain JAX, same semantics as the PyTorch forward).
    ref = x * weight.reshape(1, C, 1, 1) + bias.reshape(1, C, 1, 1)
    assert out.shape == (N, C, H, W)
    assert jnp.allclose(out, ref, atol=1e-6, rtol=1e-6)

    print("KERNEL_OK")
</pallas_src>

<mosaic_0001>
module attributes {stable_mosaic.version = 11 : i64} {
  func.func @_affine_channel_kernel(%arg0: i32, %arg1: i32, %arg2: memref<8x256xf32, #tpu.memory_space<vmem>>, %arg3: memref<8x2xf32, #tpu.memory_space<vmem>>, %arg4: memref<8x256xf32, #tpu.memory_space<vmem>>) attributes {dimension_semantics = [#tpu.dimension_semantics<parallel>, #tpu.dimension_semantics<parallel>], iteration_bounds = array<i64: 1, 1>, scalar_prefetch = 0 : i64, scratch_operands = 0 : i64, tpu.core_type = #tpu.core_type<tc>, window_params = [{transform_indices = @transform_0, window_bounds = array<i64: 8, 256>}, {transform_indices = @transform_1, window_bounds = array<i64: 8, 2>}, {transform_indices = @transform_2, window_bounds = array<i64: 8, 256>}]} {
    %c0 = arith.constant 0 : index
    %c0_0 = arith.constant 0 : index
    %0 = vector.load %arg3[%c0, %c0_0] : memref<8x2xf32, #tpu.memory_space<vmem>>, vector<8x1xf32>
    %c0_1 = arith.constant 0 : index
    %c1 = arith.constant 1 : index
    %1 = vector.load %arg3[%c0_1, %c1] : memref<8x2xf32, #tpu.memory_space<vmem>>, vector<8x1xf32>
    %c0_2 = arith.constant 0 : index
    %c0_3 = arith.constant 0 : index
    %2 = vector.load %arg2[%c0_2, %c0_3] : memref<8x256xf32, #tpu.memory_space<vmem>>, vector<8x256xf32>
    %3 = vector.broadcast %0 : vector<8x1xf32> to vector<8x256xf32>
    %4 = arith.mulf %2, %3 : vector<8x256xf32>
    %5 = vector.broadcast %1 : vector<8x1xf32> to vector<8x256xf32>
    %6 = arith.addf %4, %5 : vector<8x256xf32>
    %c0_4 = arith.constant 0 : index
    %c0_5 = arith.constant 0 : index
    %7 = vector.load %arg4[%c0_4, %c0_5] : memref<8x256xf32, #tpu.memory_space<vmem>>, vector<8x256xf32>
    tpu.vector_store %arg4[%c0_4, %c0_5], %6 {strides = array<i32>} : memref<8x256xf32, #tpu.memory_space<vmem>>, vector<8x256xf32>,
    return
  }
  func.func @transform_0(%arg0: i32, %arg1: i32) -> (i32, i32) {
    %c0_i32 = arith.constant 0 : i32
    return %arg0, %arg1 : i32, i32
  }
  func.func @transform_1(%arg0: i32, %arg1: i32) -> (i32, i32) {
    %c0_i32 = arith.constant 0 : i32
    %c0_i32_0 = arith.constant 0 : i32
    return %arg0, %c0_i32 : i32, i32
  }
  func.func @transform_2(%arg0: i32, %arg1: i32) -> (i32, i32) {
    %c0_i32 = arith.constant 0 : i32
    return %arg0, %arg1 : i32, i32
  }
}

</mosaic_0001>

<bundles_post_ra>
// kernel: tpu_custom_call.1
= control target key start
LH: loop header
LB: loop body
LE: loop exit
PB: predicated region body
PF: predicated region fallthrough
CT: control target
= control target key end

     0   :  { %7 = vsyncpa [#allocation3], 0  ;;  %s157_s0 = inlined_call_operand.hbm [shape: f32[8,256], index: 0, kind: input, shape index: {}]   ;;  %s158_s1 = inlined_call_operand.vmem [shape: f32[8,2], index: 1, kind: input, shape index: {}]   ;;  %s159_s2 = inlined_call_operand.hbm [shape: f32[8,256], index: 2, kind: output, shape index: {}]  }
   0x1   :  { %8 = vsyncpa [#allocation4], 0  ;;  %s111_s9 = smov [#allocation2]   ;;  %s63_s13 = scalar_lea.hbm %s157_s0, 256 }
   0x2   :  { %s15_s10 = sshll.u32 %s111_s9, 4  ;;  %p64_p0 = scmp.ne.s32.totalorder %s157_s0, %s63_s13  ;;  %s16_s10 = int_to_ptr.vmem [resolvable:$true] %s15_s10 }
   0x3   :  { %p67_p1 = scmp.lt.u32.totalorder %s63_s13, %s157_s0 }
   0x5   :  { %p69_p2 = pnand %p67_p1, %p64_p0 }
   0x7   :  { %72 = shalt.err (!%p69_p2)
}
   0x8   :  { %s73_s18 = scalar_lea.vmem %s16_s10, 256  ;;  %p78_p4 = scmp.lt.s32.totalorder %s16_s10, %s16_s10 }
   0x9   :  { %p74_p3 = scmp.ne.s32.totalorder %s16_s10, %s73_s18  ;;  %p79_p5 = scmp.lt.s32.totalorder %s73_s18, %s73_s18 }
   0xb   :  { %p80_p6 = por %p79_p5, %p78_p4 }
   0xd   :  { %p81_p7 = pnand %p80_p6, %p74_p3 }
   0xf   :  { %84 = shalt.err (!%p81_p7)
}
  0x10   :  { %18 = dma.hbm_to_vmem [thread:$0]  %s157_s0, 256, %s16_s10, [#allocation3]  }
  0x11   :  { %107 = dma.done.wait [#allocation3], 256  }
  0x12   :  { %108 = vsyncadd [#allocation3], 4294967040  ;;  %v112_v0 = vmov 0   ;;  %v24_v1 = vld [vmem:[%s158_s1] sm:$0xff]  ;;  %v113_v2 = vmov 1   ;;  %v26_v5 = vld [vmem:[#allocation2 + $0x8] sm:$0xff] }
  0x13   :  { %61 = vset.pattern.permute.xlu0 %v112_v0  ;;  %v25_v4 = vld [vmem:[#allocation2] sm:$0xff]  ;;  %s114_s23 = smov [#allocation5]  }
  0x14   :  { %29 = vperm.xlu0 %61, %v24_v1   ;;  %s48_s24 = sshll.u32 %s114_s23, 4  ;;  %s49_s24 = int_to_ptr.vmem [resolvable:$true] %s48_s24 }
  0x15   :  { %s85_s0 = scalar_lea.vmem %s49_s24, 256  ;;  %p90_p9 = scmp.lt.s32.totalorder %s49_s24, %s49_s24 }
  0x16   :  { %p86_p8 = scmp.ne.s32.totalorder %s49_s24, %s85_s0  ;;  %p91_p10 = scmp.lt.s32.totalorder %s85_s0, %s85_s0 }
  0x18   :  { %62 = vset.pattern.permute.xlu0 %v113_v2  ;;  %p92_p11 = por %p91_p10, %p90_p9 }
  0x19   :  { %35 = vperm.xlu0 %62, %v24_v1  }
  0x1a   :  { %p93_p12 = pnand %p92_p11, %p86_p8 }
  0x93   :  { %v30_v3 = vpop.permute.xlu0 %29 }
  0x94   :  { %v32_v6 = vmul.f32 %v30_v3, %v25_v4  ;;  %v33_v7 = vmul.f32 %v30_v3, %v26_v5 }
  0x98   :  { %v36_v8 = vpop.permute.xlu0 %35 }
  0x99   :  { %v38_v9 = vadd.f32 %v36_v8, %v32_v6  ;;  %v39_v10 = vadd.f32 %v36_v8, %v33_v7 }
  0x9b   :  { %40 = vst [vmem:[#allocation5] sm:$0xff] %v38_v9  ;;  %41 = vst [vmem:[#allocation5 + $0x8] sm:$0xff] %v39_v10 }
  0x9c   :  { %96 = shalt.err (!%p93_p12)
}
  0x9d   :  { %s97_s26 = scalar_lea.hbm %s159_s2, 256 }
  0x9e   :  { %p98_p13 = scmp.ne.s32.totalorder %s159_s2, %s97_s26  ;;  %p101_p0 = scmp.lt.u32.totalorder %s97_s26, %s159_s2 }
  0xa0   :  { %p103_p1 = pnand %p101_p0, %p98_p13 }
  0xa2   :  { %106 = shalt.err (!%p103_p1)
}
  0xa3   :  { %51 = dma.vmem_to_hbm [thread:$0]  %s49_s24, 256, %s159_s2, [#allocation4]  }
  0xa4   :  { %109 = dma.done.wait [#allocation4], 256  }
  0xa5   :  { %110 = vsyncadd [#allocation4], 4294967040 }
  0xa6   :  { %55 = vsyncpa [#allocation3], 1 }
  0xa7   :  { %56 = vsyncpa [#allocation4], 1 }

</bundles_post_ra>
